<compile_context>
chip_gen: v6e
topology: v6e:2x2x1
jax: 0.10.0
libtpu: 0.0.40
codegen_flags: <defaults>
</compile_context>

<pallas_src>
import functools

import jax
import jax.numpy as jnp
from jax import lax
from jax.experimental import pallas as pl
from jax.experimental.pallas import tpu as pltpu


def _round_up(x, m):
    return ((x + m - 1) // m) * m


# ---------------------------------------------------------------------------
# Kernel A: projector (Linear) + L2 normalize + fold 1/sqrt(temperature)
# ---------------------------------------------------------------------------
def _project_normalize_kernel(x_ref, w_ref, b_ref, z_ref, *, inv_sqrt_temp, eps):
    # x_ref: [TR, Din_p] bf16 | w_ref: [Din_p, Dp_p] bf16 | b_ref: [1, Dp_p] f32
    z = jnp.dot(x_ref[...], w_ref[...], preferred_element_type=jnp.float32)
    z = z + b_ref[...]                                          # [TR, Dp_p] f32
    ss = jnp.sum(z * z, axis=1, keepdims=True)                  # [TR, 1]
    z = z * lax.rsqrt(jnp.maximum(ss, eps * eps))               # F.normalize(p=2)
    z_ref[...] = (z * inv_sqrt_temp).astype(z_ref.dtype)        # temp folded in


# ---------------------------------------------------------------------------
# Kernel B: row-tiled NxN similarity + masked log-softmax + per-row loss
# ---------------------------------------------------------------------------
def _supcon_loss_kernel(z_ref, lrow_ref, lcol_ref, loss_ref, *, n_valid, row_scale):
    # z_ref:    [N_p, Dp_p] bf16 (resident, already normalized & /sqrt(T))
    # lrow_ref: [TR, 1]  int32 anchor labels for this row block (-1 = padding)
    # lcol_ref: [1, N_p] int32 contrast labels (-1 = padding)
    # loss_ref: [TR, 1]  f32 per-anchor loss, already scaled by -(T/base_T)/N
    i = pl.program_id(0)
    tr = lrow_ref.shape[0]
    n_pad = z_ref.shape[0]

    row0 = pl.multiple_of(i * tr, tr)
    z_a = z_ref[pl.ds(row0, tr), :]                             # [TR, Dp_p] anchors
    z_c = z_ref[...]                                            # [N_p, Dp_p] contrast

    # sim = (z_a @ z_c.T) / temperature   (temperature already folded into z)
    sim = lax.dot_general(z_a, z_c, (((1,), (1,)), ((), ())),
                          preferred_element_type=jnp.float32)   # [TR, N_p]

    row_g = row0 + lax.broadcasted_iota(jnp.int32, (tr, n_pad), 0)
    col = lax.broadcasted_iota(jnp.int32, (tr, n_pad), 1)
    valid = (col < n_valid) & (row_g != col)                    # drop diag + padding

    neg_big = jnp.float32(-1e30)
    sim = jnp.where(valid, sim, neg_big)                        # mask folded into logits

    row_max = jnp.max(sim, axis=1, keepdims=True)               # [TR, 1]
    logits = sim - row_max
    denom = jnp.sum(jnp.exp(logits), axis=1, keepdims=True)     # masked entries exp->0
    # TODO(synk): non-empty confident_unknown_features (extra exp-sum added to the
    # denominator) is not implemented; the empty case contributes 0 as in the reference.
    log_denom = jnp.log(denom)                                  # [TR, 1]

    # positive mask: same (tiled) label, excluding diagonal / padded columns
    pos = (lrow_ref[...] == lcol_ref[...]) & valid              # [TR, N_p] bool
    posf = pos.astype(jnp.float32)
    pos_cnt = jnp.sum(posf, axis=1, keepdims=True)              # [TR, 1]
    pos_logit_sum = jnp.sum(posf * logits, axis=1, keepdims=True)

    # sum_pos(log_prob) = sum_pos(logits) - cnt * log_denom  (avoids NxN subtract)
    inv_cnt = pl.reciprocal(jnp.maximum(pos_cnt, 1.0), approx=True)
    mean_log_prob_pos = (pos_logit_sum - pos_cnt * log_denom) * inv_cnt

    row_valid = (row0 + lax.broadcasted_iota(jnp.int32, (tr, 1), 0)) < n_valid
    loss_ref[...] = jnp.where(row_valid, row_scale * mean_log_prob_pos, 0.0)


# ---------------------------------------------------------------------------
# Wrapper
# ---------------------------------------------------------------------------
def supcon_loss(features, proj_w, proj_b, labels=None, mask=None,
                temperature=0.07, base_temperature=None, contrast_mode='all'):
    """features: [bsz, n_views, ...] -> scalar loss (contrast_mode='all')."""
    if features.ndim < 3:
        raise ValueError('`features` needs to be [bsz, n_views, ...]')
    if base_temperature is None:
        base_temperature = temperature
    if contrast_mode != 'all':
        # TODO(synk): contrast_mode='one' (unprojected anchor slice) not implemented.
        raise ValueError('Only contrast_mode="all" is implemented')

    bsz = features.shape[0]
    n_views = features.shape[1]
    feats = features.reshape(bsz, n_views, -1).astype(jnp.float32)

    if labels is not None and mask is not None:
        raise ValueError('Cannot define both `labels` and `mask`')
    if mask is not None:
        # TODO(synk): arbitrary/asymmetric [bsz,bsz] masks are not expressible as
        # per-sample labels; only the labels / SimCLR(eye) paths are implemented.
        raise NotImplementedError('explicit `mask` is not supported by this kernel')
    if labels is None:
        labels_arr = jnp.arange(bsz, dtype=jnp.int32)   # eye mask == identity labels
    else:
        labels_arr = jnp.asarray(labels).reshape(-1).astype(jnp.int32)
        if labels_arr.shape[0] != bsz:
            raise ValueError('Num of labels does not match num of features')

    # torch.cat(torch.unbind(features, dim=1), dim=0)  (view-major rows)
    contrast_feature = jnp.swapaxes(feats, 0, 1).reshape(n_views * bsz, -1)

    n_total, d_in = contrast_feature.shape
    d_proj = proj_w.shape[-1]

    # pad N to a multiple of 128 (minimal waste); pick the largest row tile that
    # divides N_pad while keeping [TR, N_pad] f32 intermediates comfortably in VMEM
    n_pad = _round_up(n_total, 128)
    tr = 256 if (n_pad % 256 == 0 and n_pad <= 4096) else 128
    din_pad = _round_up(d_in, 128)
    dp_pad = _round_up(d_proj, 128)
    n_blocks = n_pad // tr

    # zero-pad to lane/sublane-aligned shapes; bf16 inputs for MXU
    x_p = jnp.zeros((n_pad, din_pad), jnp.bfloat16)
    x_p = x_p.at[:n_total, :d_in].set(contrast_feature.astype(jnp.bfloat16))
    w_p = jnp.zeros((din_pad, dp_pad), jnp.bfloat16)
    w_p = w_p.at[:d_in, :d_proj].set(proj_w.astype(jnp.bfloat16))
    b_p = jnp.zeros((1, dp_pad), jnp.float32)
    b_p = b_p.at[0, :d_proj].set(proj_b.reshape(-1).astype(jnp.float32))

    lab_full = jnp.tile(labels_arr, n_views)                       # [N] int32
    lab_pad = jnp.full((n_pad,), -1, dtype=jnp.int32).at[:n_total].set(lab_full)
    lab_row = lab_pad.reshape(n_pad, 1)
    lab_col = lab_pad.reshape(1, n_pad)

    inv_sqrt_temp = float(1.0 / (temperature ** 0.5))
    # fold -(T/base_T) and the final 1/N mean into the per-row result
    row_scale = float(-(temperature / base_temperature) / n_total)

    # ---- kernel A: projector + normalize (row-tiled, parallel) ----
    proj_kernel = functools.partial(_project_normalize_kernel,
                                    inv_sqrt_temp=inv_sqrt_temp, eps=1e-12)
    z = pl.pallas_call(
        proj_kernel,
        out_shape=jax.ShapeDtypeStruct((n_pad, dp_pad), jnp.bfloat16),
        grid=(n_blocks,),
        in_specs=[
            pl.BlockSpec((tr, din_pad), lambda i: (i, 0)),
            pl.BlockSpec((din_pad, dp_pad), lambda i: (0, 0)),
            pl.BlockSpec((1, dp_pad), lambda i: (0, 0)),
        ],
        out_specs=pl.BlockSpec((tr, dp_pad), lambda i: (i, 0)),
        compiler_params=pltpu.CompilerParams(
            dimension_semantics=("parallel",)),
    )(x_p, w_p, b_p)

    # ---- kernel B: row-tiled contrastive loss (parallel over row blocks) ----
    loss_kernel = functools.partial(_supcon_loss_kernel,
                                    n_valid=n_total, row_scale=row_scale)
    per_row = pl.pallas_call(
        loss_kernel,
        out_shape=jax.ShapeDtypeStruct((n_pad, 1), jnp.float32),
        grid=(n_blocks,),
        in_specs=[
            pl.BlockSpec((n_pad, dp_pad), lambda i: (0, 0)),   # z resident
            pl.BlockSpec((tr, 1), lambda i: (i, 0)),           # anchor labels
            pl.BlockSpec((1, n_pad), lambda i: (0, 0)),        # contrast labels
        ],
        out_specs=pl.BlockSpec((tr, 1), lambda i: (i, 0)),
        compiler_params=pltpu.CompilerParams(
            dimension_semantics=("parallel",)),
    )(z, lab_row, lab_col)

    # final reduce: mean and sign already folded into row_scale; padded rows are 0
    return jnp.sum(per_row)


# ---------------------------------------------------------------------------
# Pure-JAX f32 reference (mirrors the PyTorch math) for a sanity check
# ---------------------------------------------------------------------------
def _ref_supcon_loss(features, proj_w, proj_b, labels, temperature):
    bsz, n_views = features.shape[:2]
    feats = features.reshape(bsz, n_views, -1).astype(jnp.float32)
    cf = jnp.swapaxes(feats, 0, 1).reshape(n_views * bsz, -1)
    z = cf @ proj_w.astype(jnp.float32) + proj_b.reshape(-1).astype(jnp.float32)
    z = z / jnp.maximum(jnp.sqrt(jnp.sum(z * z, axis=1, keepdims=True)), 1e-12)
    n = z.shape[0]
    sim = (z @ z.T) / temperature
    lab = jnp.arange(bsz, dtype=jnp.int32) if labels is None else labels.astype(jnp.int32)
    lab_full = jnp.tile(lab.reshape(-1), n_views)
    pos = (lab_full[:, None] == lab_full[None, :]).astype(jnp.float32)
    logits_mask = 1.0 - jnp.eye(n, dtype=jnp.float32)
    pos = pos * logits_mask
    logits = sim - jnp.max(sim, axis=1, keepdims=True)
    exp_logits = jnp.exp(logits) * logits_mask
    log_prob = logits - jnp.log(jnp.sum(exp_logits, axis=1, keepdims=True))
    mean_log_prob_pos = jnp.sum(pos * log_prob, axis=1) / jnp.sum(pos, axis=1)
    return -jnp.mean(mean_log_prob_pos)   # T/base_T == 1 here


if __name__ == "__main__":
    key = jax.random.PRNGKey(0)
    k_feat, k_w, k_b, k_lab = jax.random.split(key, 4)

    bsz, n_views, feat_dim, proj_dim = 8, 2, 32, 16

    # deterministic synthetic inputs / projector parameters
    features = jax.random.normal(k_feat, (bsz, n_views, feat_dim), dtype=jnp.float32)
    proj_w = jax.random.normal(k_w, (feat_dim, proj_dim), dtype=jnp.float32) * 0.1
    proj_b = jax.random.normal(k_b, (proj_dim,), dtype=jnp.float32) * 0.01

    # SimCLR (unsupervised) path: labels=None, mask=None
    loss = supcon_loss(features, proj_w, proj_b, temperature=0.07)
    jax.block_until_ready(loss)
    assert loss.shape == () and bool(jnp.isfinite(loss))
    ref = _ref_supcon_loss(features, proj_w, proj_b, None, 0.07)
    assert abs(float(loss) - float(ref)) < 0.2 + 0.1 * abs(float(ref)), (float(loss), float(ref))

    # Supervised path with labels
    labels = jax.random.randint(k_lab, (bsz,), 0, 4)
    loss_sup = supcon_loss(features, proj_w, proj_b, labels=labels, temperature=0.07)
    jax.block_until_ready(loss_sup)
    assert loss_sup.shape == () and bool(jnp.isfinite(loss_sup))
    ref_sup = _ref_supcon_loss(features, proj_w, proj_b, labels, 0.07)
    assert abs(float(loss_sup) - float(ref_sup)) < 0.2 + 0.1 * abs(float(ref_sup)), (
        float(loss_sup), float(ref_sup))

    print("KERNEL_OK")
</pallas_src>

<mosaic_0001>
module attributes {stable_mosaic.version = 11 : i64} {
  func.func @_project_normalize_kernel(%arg0: i32, %arg1: memref<128x128xbf16, #tpu.memory_space<vmem>>, %arg2: memref<128x128xbf16, #tpu.memory_space<vmem>>, %arg3: memref<1x128xf32, #tpu.memory_space<vmem>>, %arg4: memref<128x128xbf16, #tpu.memory_space<vmem>>) attributes {dimension_semantics = [#tpu.dimension_semantics<parallel>], iteration_bounds = array<i64: 1>, scalar_prefetch = 0 : i64, scratch_operands = 0 : i64, tpu.core_type = #tpu.core_type<tc>, window_params = [{transform_indices = @transform_0, window_bounds = array<i64: 128, 128>}, {pipeline_mode = #tpu.pipeline_mode<synchronous>, transform_indices = @transform_1, window_bounds = array<i64: 128, 128>}, {pipeline_mode = #tpu.pipeline_mode<synchronous>, transform_indices = @transform_2, window_bounds = array<i64: 1, 128>}, {transform_indices = @transform_3, window_bounds = array<i64: 128, 128>}]} {
    %c0 = arith.constant 0 : index
    %c0_0 = arith.constant 0 : index
    %0 = vector.load %arg1[%c0, %c0_0] : memref<128x128xbf16, #tpu.memory_space<vmem>>, vector<128x128xbf16>
    %c0_1 = arith.constant 0 : index
    %c0_2 = arith.constant 0 : index
    %1 = vector.load %arg2[%c0_1, %c0_2] : memref<128x128xbf16, #tpu.memory_space<vmem>>, vector<128x128xbf16>
    %cst = arith.constant dense<0.000000e+00> : vector<128x128xf32>
    %2 = tpu.matmul %0, %1, %cst {dimension_numbers = #tpu.dot_dimension_numbers<[1], [0], [0], [1], [0, 0, 1, 1], [], []>} : vector<128x128xbf16>, vector<128x128xbf16>, vector<128x128xf32> -> vector<128x128xf32>
    %c0_3 = arith.constant 0 : index
    %c0_4 = arith.constant 0 : index
    %3 = vector.load %arg3[%c0_3, %c0_4] : memref<1x128xf32, #tpu.memory_space<vmem>>, vector<1x128xf32>
    %4 = vector.broadcast %3 : vector<1x128xf32> to vector<128x128xf32>
    %5 = arith.addf %2, %4 : vector<128x128xf32>
    %6 = arith.mulf %5, %5 : vector<128x128xf32>
    %cst_5 = arith.constant dense<0.000000e+00> : vector<128xf32>
    %7 = vector.multi_reduction <add>, %6, %cst_5 [1] : vector<128x128xf32> to vector<128xf32>
    %8 = vector.shape_cast %7 : vector<128xf32> to vector<128x1xf32>
    %cst_6 = arith.constant 1.000000e-24 : f32
    %9 = vector.broadcast %cst_6 : f32 to vector<128x1xf32>
    %10 = arith.maximumf %8, %9 : vector<128x1xf32>
    %11 = math.rsqrt %10 : vector<128x1xf32>
    %12 = vector.broadcast %11 : vector<128x1xf32> to vector<128x128xf32>
    %13 = arith.mulf %5, %12 : vector<128x128xf32>
    %cst_7 = arith.constant 3.77964473 : f32
    %14 = vector.broadcast %cst_7 : f32 to vector<128x128xf32>
    %15 = arith.mulf %13, %14 : vector<128x128xf32>
    %16 = arith.truncf %15 : vector<128x128xf32> to vector<128x128xbf16>
    %c0_8 = arith.constant 0 : index
    %c0_9 = arith.constant 0 : index
    %17 = vector.load %arg4[%c0_8, %c0_9] : memref<128x128xbf16, #tpu.memory_space<vmem>>, vector<128x128xbf16>
    tpu.vector_store %arg4[%c0_8, %c0_9], %16 {strides = array<i32>} : memref<128x128xbf16, #tpu.memory_space<vmem>>, vector<128x128xbf16>,
    return
  }
  func.func @transform_0(%arg0: i32) -> (i32, i32) {
    %c0_i32 = arith.constant 0 : i32
    %c0_i32_0 = arith.constant 0 : i32
    return %arg0, %c0_i32 : i32, i32
  }
  func.func @transform_1(%arg0: i32) -> (i32, i32) {
    %c0_i32 = arith.constant 0 : i32
    %c0_i32_0 = arith.constant 0 : i32
    %c0_i32_1 = arith.constant 0 : i32
    return %c0_i32, %c0_i32_0 : i32, i32
  }
  func.func @transform_2(%arg0: i32) -> (i32, i32) {
    %c0_i32 = arith.constant 0 : i32
    %c0_i32_0 = arith.constant 0 : i32
    %c0_i32_1 = arith.constant 0 : i32
    return %c0_i32, %c0_i32_0 : i32, i32
  }
  func.func @transform_3(%arg0: i32) -> (i32, i32) {
    %c0_i32 = arith.constant 0 : i32
    %c0_i32_0 = arith.constant 0 : i32
    return %arg0, %c0_i32 : i32, i32
  }
}

</mosaic_0001>

<bundles_post_ra>
// kernel: tpu_custom_call.1
= control target key start
LH: loop header
LB: loop body
LE: loop exit
PB: predicated region body
PF: predicated region fallthrough
CT: control target
= control target key end

     0   :  { %8 = vsyncpa [#allocation3], 0  ;;  %s891_s0 = inlined_call_operand.hbm [shape: bf16[128,128], index: 0, kind: input, shape index: {}]   ;;  %s892_s1 = inlined_call_operand.hbm [shape: bf16[128,128], index: 1, kind: input, shape index: {}]   ;;  %s893_s2 = inlined_call_operand.vmem [shape: f32[1,128], index: 2, kind: input, shape index: {}]   ;;  %s894_s3 = inlined_call_operand.hbm [shape: bf16[128,128], index: 3, kind: output, shape index: {}]  }
   0x1   :  { %9 = vsyncpa [#allocation6], 0 }
   0x2   :  { %10 = vsyncpa [#allocation4], 0  ;;  %s765_s12 = smov [#allocation2]  }
   0x3   :  { %s16_s13 = sshll.u32 %s765_s12, 4  ;;  %s17_s13 = int_to_ptr.vmem [resolvable:$true] %s16_s13 }
   0x4   :  { %s707_s14 = scalar_lea.vmem %s17_s13, 1024  ;;  %p712_p1 = scmp.lt.s32.totalorder %s17_s13, %s17_s13 }
   0x5   :  { %p708_p0 = scmp.ne.s32.totalorder %s17_s13, %s707_s14  ;;  %p713_p2 = scmp.lt.s32.totalorder %s707_s14, %s707_s14 }
   0x7   :  { %p714_p3 = por %p713_p2, %p712_p1 }
   0x9   :  { %p715_p4 = pnand %p714_p3, %p708_p0 }
   0xb   :  { %718 = shalt.err (!%p715_p4)
}
   0xc   :  { %s766_s15 = smov 64   ;;  %s767_s16 = smov 4  }
   0xd   :  { %22 = dma.hbm_to_vmem [thread:$0]  %s891_s0, 1024, %s17_s13, [#allocation3], %s766_s15, %s766_s15, %s767_s16  }
   0xe   :  { %s768_s19 = smov [#allocation5]  }
   0xf   :  { %s28_s20 = sshll.u32 %s768_s19, 4  ;;  %s29_s20 = int_to_ptr.vmem [resolvable:$true] %s28_s20 }
  0x10   :  { %s727_s21 = scalar_lea.vmem %s29_s20, 1024  ;;  %p732_p6 = scmp.lt.s32.totalorder %s29_s20, %s29_s20 }
  0x11   :  { %p728_p5 = scmp.ne.s32.totalorder %s29_s20, %s727_s21  ;;  %p733_p7 = scmp.lt.s32.totalorder %s727_s21, %s727_s21 }
  0x13   :  { %p734_p8 = por %p733_p7, %p732_p6 }
  0x15   :  { %p735_p9 = pnand %p734_p8, %p728_p5 }
  0x17   :  { %738 = shalt.err (!%p735_p9)
}
  0x18   :  { %34 = dma.hbm_to_vmem [thread:$0]  %s892_s1, 1024, %s29_s20, [#allocation6], %s766_s15, %s766_s15, %s767_s16  }
  0x19   :  { %759 = dma.done.wait [#allocation3], 1024  }
  0x1a   :  { %760 = vsyncadd [#allocation3], 4294966272 }
  0x1b   :  { %761 = dma.done.wait [#allocation6], 1024  }
  0x1c   :  { %762 = vsyncadd [#allocation6], 4294966272  ;;  %v651_v0 = vld [vmem:[#allocation5 + $0x38] sm:$0xff]   ;;  %v652_v1 = vld [vmem:[#allocation5 + $0x30] sm:$0xff]  }
  0x1d   :  { %598 = vmatprep.subr.bf16.mxu0 %v651_v0  ;;  %630 = vmatprep.subr.bf16.mxu1 %v651_v0  ;;  %v653_v2 = vld [vmem:[#allocation5 + $0x28] sm:$0xff]   ;;  %v654_v3 = vld [vmem:[#allocation5 + $0x20] sm:$0xff]   ;;  %v655_v6 = vld [vmem:[#allocation5 + $0x18] sm:$0xff]  }
  0x1e   :  { %599 = vmatpush3.bf16.msra.mxu0 %v651_v0  ;;  %638 = vmatpush3.bf16.msra.mxu1 %v651_v0  ;;  %v659_v4 = vld [vmem:[#allocation2] sm:$0xff]   ;;  %v656_v7 = vld [vmem:[#allocation5 + $0x10] sm:$0xff]   ;;  %v657_v8 = vld [vmem:[#allocation5 + $0x8] sm:$0xff]  }
  0x1f   :  { %600 = vmatprep.subr.bf16.mxu0 %v652_v1  ;;  %631 = vmatprep.subr.bf16.mxu1 %v652_v1  ;;  %v660_v5 = vld [vmem:[#allocation2 + $0x20] sm:$0xff]   ;;  %v661_v10 = vld [vmem:[#allocation2 + $0x8] sm:$0xff]   ;;  %v663_v12 = vld [vmem:[#allocation2 + $0x10] sm:$0xff]  }
  0x20   :  { %614 = vmatprep.mubr.bf16.mxu0 %v659_v4  ;;  %622 = vmatprep.mubr.bf16.mxu1 %v660_v5  ;;  %v658_v9 = vld [vmem:[#allocation5] sm:$0xff]   ;;  %v662_v11 = vld [vmem:[#allocation2 + $0x28] sm:$0xff]   ;;  %v665_v13 = vld [vmem:[#allocation2 + $0x30] sm:$0xff]  }
  0x21   :  { %v664_v14 = vld [vmem:[#allocation2 + $0x18] sm:$0xff]   ;;  %v486_v16 = vld [vmem:[%s893_s2] ss:$0 sm:$0xff]  ;;  %s769_s2 = smov [#allocation7]  }
  0x22   :  { %601 = vmatpush3.bf16.msra.mxu0 %v652_v1  ;;  %639 = vmatpush3.bf16.msra.mxu1 %v652_v1  ;;  %v666_v15 = vld [vmem:[#allocation2 + $0x38] sm:$0xff]   ;;  %s473_s24 = sshll.u32 %s769_s2, 4  ;;  %s474_s24 = int_to_ptr.vmem [resolvable:$true] %s473_s24 }
  0x23   :  { %602 = vmatprep.subr.bf16.mxu0 %v653_v2  ;;  %632 = vmatprep.subr.bf16.mxu1 %v653_v2  ;;  %s739_s25 = scalar_lea.vmem %s474_s24, 1024  ;;  %p744_p11 = scmp.lt.s32.totalorder %s474_s24, %s474_s24 }
  0x24   :  { %p740_p10 = scmp.ne.s32.totalorder %s474_s24, %s739_s25  ;;  %p745_p12 = scmp.lt.s32.totalorder %s739_s25, %s739_s25 }
  0x26   :  { %603 = vmatpush3.bf16.msra.mxu0 %v653_v2  ;;  %640 = vmatpush3.bf16.msra.mxu1 %v653_v2  ;;  %p746_p13 = por %p745_p12, %p744_p11 }
  0x27   :  { %604 = vmatprep.subr.bf16.mxu0 %v654_v3  ;;  %633 = vmatprep.subr.bf16.mxu1 %v654_v3 }
  0x28   :  { %p747_p0 = pnand %p746_p13, %p740_p10 }
  0x2a   :  { %605 = vmatpush3.bf16.msra.mxu0 %v654_v3  ;;  %641 = vmatpush3.bf16.msra.mxu1 %v654_v3 }
  0x2b   :  { %606 = vmatprep.subr.bf16.mxu0 %v655_v6  ;;  %634 = vmatprep.subr.bf16.mxu1 %v655_v6 }
  0x2e   :  { %607 = vmatpush3.bf16.msra.mxu0 %v655_v6  ;;  %642 = vmatpush3.bf16.msra.mxu1 %v655_v6 }
  0x2f   :  { %608 = vmatprep.subr.bf16.mxu0 %v656_v7  ;;  %635 = vmatprep.subr.bf16.mxu1 %v656_v7 }
  0x32   :  { %609 = vmatpush3.bf16.msra.mxu0 %v656_v7  ;;  %643 = vmatpush3.bf16.msra.mxu1 %v656_v7 }
  0x33   :  { %610 = vmatprep.subr.bf16.mxu0 %v657_v8  ;;  %636 = vmatprep.subr.bf16.mxu1 %v657_v8 }
  0x36   :  { %611 = vmatpush3.bf16.msra.mxu0 %v657_v8  ;;  %644 = vmatpush3.bf16.msra.mxu1 %v657_v8 }
  0x37   :  { %612 = vmatprep.subr.bf16.mxu0 %v658_v9  ;;  %637 = vmatprep.subr.bf16.mxu1 %v658_v9 }
  0x3a   :  { %613 = vmatpush3.bf16.msra.mxu0 %v658_v9  ;;  %645 = vmatpush3.bf16.msra.mxu1 %v658_v9 }
  0x3d   :  { %615 = vmatmul.mubr.bf16.vlgmr.msra.gmra.mxu0 %v661_v10  ;;  %623 = vmatmul.mubr.bf16.vlgmr.msra.gmra.mxu1 %v662_v11 }
  0x3e   :  { %618 = vmatprep.mubr.bf16.mxu0 %v663_v12  ;;  %626 = vmatprep.mubr.bf16.mxu1 %v665_v13 }
  0x45   :  { %619 = vmatmul.mubr.bf16.gmra.mxu0 %v664_v14  ;;  %627 = vmatmul.mubr.bf16.gmra.mxu1 %v666_v15 }
  0xfd   :  { %v616_v17 = vpop.f32.mrf.mxu0  ;;  %v624_v18 = vpop.f32.mrf.mxu1 }
  0xfe   :  { %v805_v19 = vadd.f32 %v616_v17, %v486_v16  ;;  %v807_v20 = vadd.f32 %v624_v18, %v486_v16 }
  0xff   :  { %v213_v21 = vpop.f32.mrf.mxu0  ;;  %v245_v22 = vpop.f32.mrf.mxu1 }
 0x100   :  { %v809_v23 = vadd.f32 %v486_v16, %v213_v21  ;;  %v286_v24 = vmul.f32 %v807_v20, %v807_v20  ;;  %v278_v25 = vmul.f32 %v805_v19, %v805_v19  ;;  %v817_v31 = vadd.f32 %v486_v16, %v245_v22 }
 0x101   :  { %v617_v26 = vpop.f32.mrf.mxu0  ;;  %v625_v27 = vpop.f32.mrf.mxu1 }
 0x102   :  { %v815_v28 = vadd.f32 %v617_v26, %v486_v16  ;;  %312 = vadd.xlane.f32.xlu0 %v286_v24  ;;  %296 = vadd.xlane.f32.xlu1 %v278_v25  ;;  %v819_v32 = vadd.f32 %v625_v27, %v486_v16  ;;  %v276_v34 = vmul.f32 %v809_v23, %v809_v23 }
 0x103   :  { %v216_v29 = vpop.f32.mrf.mxu0  ;;  %v248_v30 = vpop.f32.mrf.mxu1  ;;  %v284_v41 = vmul.f32 %v817_v31, %v817_v31 }
 0x104   :  { %v279_v33 = vmul.f32 %v815_v28, %v815_v28  ;;  %v825_v38 = vadd.f32 %v486_v16, %v216_v29  ;;  %v827_v39 = vadd.f32 %v486_v16, %v248_v30  ;;  %v287_v40 = vmul.f32 %v819_v32, %v819_v32 }
 0x105   :  { %v620_v35 = vpop.f32.mrf.mxu0  ;;  %v628_v36 = vpop.f32.mrf.mxu1 }
 0x106   :  { %298 = vadd.xlane.f32.xlu1 %v279_v33  ;;  %292 = vadd.xlane.f32.xlu0 %v276_v34  ;;  %v833_v44 = vadd.f32 %v620_v35, %v486_v16  ;;  %v285_v46 = vmul.f32 %v827_v39, %v827_v39  ;;  %v277_v47 = vmul.f32 %v825_v38, %v825_v38 }
 0x107   :  { %v229_v37 = vpop.f32.mrf.mxu0  ;;  %v261_v43 = vpop.f32.mrf.mxu1  ;;  %v857_v59 = vadd.f32 %v628_v36, %v486_v16 }
 0x108   :  { %v841_v50 = vadd.f32 %v486_v16, %v229_v37  ;;  %v282_v53 = vmul.f32 %v833_v44, %v833_v44  ;;  %v849_v55 = vadd.f32 %v486_v16, %v261_v43 }
 0x109   :  { %v621_v42 = vpop.f32.mrf.mxu0  ;;  %v629_v49 = vpop.f32.mrf.mxu1  ;;  %v290_v0 = vmul.f32 %v857_v59, %v857_v59 }
 0x10a   :  { %314 = vadd.xlane.f32.xlu1 %v287_v40  ;;  %308 = vadd.xlane.f32.xlu0 %v284_v41  ;;  %v835_v45 = vadd.f32 %v621_v42, %v486_v16  ;;  %v280_v58 = vmul.f32 %v841_v50, %v841_v50  ;;  %v859_v60 = vadd.f32 %v629_v49, %v486_v16 }
 0x10b   :  { %v232_v48 = vpop.f32.mrf.mxu0  ;;  %v264_v54 = vpop.f32.mrf.mxu1  ;;  %v288_v62 = vmul.f32 %v849_v55, %v849_v55 }
 0x10c   :  { %v843_v51 = vadd.f32 %v486_v16, %v232_v48  ;;  %v283_v52 = vmul.f32 %v835_v45, %v835_v45  ;;  %v851_v56 = vadd.f32 %v486_v16, %v264_v54  ;;  %v291_v63 = vmul.f32 %v859_v60, %v859_v60 }
 0x10e   :  { %310 = vadd.xlane.f32.xlu1 %v285_v46  ;;  %294 = vadd.xlane.f32.xlu0 %v277_v47  ;;  %v281_v57 = vmul.f32 %v843_v51, %v843_v51  ;;  %v289_v61 = vmul.f32 %v851_v56, %v851_v56 }
 0x112   :  { %306 = vadd.xlane.f32.xlu1 %v283_v52  ;;  %304 = vadd.xlane.f32.xlu0 %v282_v53 }
 0x116   :  { %302 = vadd.xlane.f32.xlu1 %v281_v57  ;;  %300 = vadd.xlane.f32.xlu0 %v280_v58 }
 0x11a   :  { %318 = vadd.xlane.f32.xlu1 %v289_v61  ;;  %316 = vadd.xlane.f32.xlu0 %v288_v62 }
 0x11e   :  { %322 = vadd.xlane.f32.xlu1 %v291_v63  ;;  %320 = vadd.xlane.f32.xlu0 %v290_v0 }
 0x18b   :  { %v313_v1 = vpop.xlane.xlu0 %312  ;;  %v297_v2 = vpop.xlane.xlu1 %296 }
 0x18c   :  { %v326_v3 = vmax.f32 %v297_v2, 1e-24  ;;  %v334_v4 = vmax.f32 %v313_v1, 1e-24 }
 0x18e   :  { %667 = vrsqrt.f32 %v326_v3 }
 0x18f   :  { %v299_v5 = vpop.xlane.xlu1 %298  ;;  %v293_v6 = vpop.xlane.xlu0 %292  ;;  %669 = vrsqrt.f32 %v334_v4 }
 0x190   :  { %v327_v7 = vmax.f32 %v299_v5, 1e-24  ;;  %v324_v8 = vmax.f32 %v293_v6, 1e-24 }
 0x192   :  { %671 = vrsqrt.f32 %v327_v7 }
 0x193   :  { %v315_v9 = vpop.xlane.xlu1 %314  ;;  %v309_v10 = vpop.xlane.xlu0 %308  ;;  %673 = vrsqrt.f32 %v324_v8 }
 0x194   :  { %v335_v11 = vmax.f32 %v315_v9, 1e-24  ;;  %v332_v12 = vmax.f32 %v309_v10, 1e-24 }
 0x196   :  { %675 = vrsqrt.f32 %v335_v11 }
 0x197   :  { %677 = vrsqrt.f32 %v332_v12  ;;  %v311_v13 = vpop.xlane.xlu1 %310  ;;  %v295_v14 = vpop.xlane.xlu0 %294 }
 0x198   :  { %v333_v15 = vmax.f32 %v311_v13, 1e-24  ;;  %v325_v16 = vmax.f32 %v295_v14, 1e-24 }
 0x19a   :  { %679 = vrsqrt.f32 %v333_v15 }
 0x19b   :  { %681 = vrsqrt.f32 %v325_v16  ;;  %v307_v17 = vpop.xlane.xlu1 %306  ;;  %v305_v18 = vpop.xlane.xlu0 %304 }
 0x19c   :  { %v668_v21 = vpop.eup %667  ;;  %v331_v22 = vmax.f32 %v307_v17, 1e-24  ;;  %v330_v24 = vmax.f32 %v305_v18, 1e-24 }
 0x19d   :  { %v670_v25 = vpop.eup %669  ;;  %v358_v26 = vmul.f32 %v668_v21, %v805_v19 }
 0x19e   :  { %683 = vrsqrt.f32 %v331_v22  ;;  %v366_v37 = vmul.f32 %v670_v25, %v807_v20 }
 0x19f   :  { %v672_v27 = vpop.eup %671  ;;  %685 = vrsqrt.f32 %v330_v24  ;;  %v303_v29 = vpop.xlane.xlu1 %302  ;;  %v374_v40 = vmul.f32 3.7796447, %v358_v26 }
 0x1a0   :  { %v301_v30 = vpop.xlane.xlu0 %300  ;;  %v359_v33 = vmul.f32 %v672_v27, %v815_v28  ;;  %v329_v34 = vmax.f32 %v303_v29, 1e-24  ;;  %v674_v36 = vpop.eup %673  ;;  %v382_v53 = vmul.f32 3.7796447, %v366_v37 }
 0x1a1   :  { %v328_v35 = vmax.f32 %v301_v30, 1e-24  ;;  %v356_v57 = vmul.f32 %v674_v36, %v809_v23 }
 0x1a2   :  { %v375_v41 = vmul.f32 3.7796447, %v359_v33  ;;  %687 = vrsqrt.f32 %v329_v34 }
 0x1a3   :  { %v676_v42 = vpop.eup %675  ;;  %689 = vrsqrt.f32 %v328_v35  ;;  %v319_v43 = vpop.xlane.xlu1 %318  ;;  %v372_v5 = vmul.f32 3.7796447, %v356_v57 }
 0x1a4   :  { %v317_v46 = vpop.xlane.xlu0 %316  ;;  %v678_v19 = vpop.eup %677  ;;  %v543_v47 = vpack.c.bf16 %v375_v41, %v374_v40  ;;  %v367_v48 = vmul.f32 %v676_v42, %v819_v32  ;;  %v337_v49 = vmax.f32 %v319_v43, 1e-24 }
 0x1a5   :  { %v336_v52 = vmax.f32 %v317_v46, 1e-24  ;;  %v364_v54 = vmul.f32 %v678_v19, %v817_v31 }
 0x1a6   :  { %575 = vst [vmem:[#allocation7 + $0x8] sm:$0xff] %v543_v47   ;;  %v383_v28 = vmul.f32 3.7796447, %v367_v48  ;;  %691 = vrsqrt.f32 %v337_v49 }
 0x1a7   :  { %v680_v20 = vpop.eup %679  ;;  %693 = vrsqrt.f32 %v336_v52  ;;  %v323_v58 = vpop.xlane.xlu1 %322  ;;  %v380_v3 = vmul.f32 3.7796447, %v364_v54 }
 0x1a8   :  { %v321_v61 = vpop.xlane.xlu0 %320  ;;  %v682_v62 = vpop.eup %681  ;;  %v563_v63 = vpack.c.bf16 %v383_v28, %v382_v53  ;;  %v365_v0 = vmul.f32 %v680_v20, %v827_v39  ;;  %v339_v1 = vmax.f32 %v323_v58, 1e-24 }
 0x1a9   :  { %v338_v32 = vmax.f32 %v321_v61, 1e-24  ;;  %v357_v2 = vmul.f32 %v682_v62, %v825_v38 }
 0x1aa   :  { %579 = vst [vmem:[#allocation7 + $0x28] sm:$0xff] %v563_v63   ;;  %v381_v4 = vmul.f32 3.7796447, %v365_v0  ;;  %695 = vrsqrt.f32 %v339_v1 }
 0x1ab   :  { %v684_v31 = vpop.eup %683  ;;  %v373_v6 = vmul.f32 3.7796447, %v357_v2  ;;  %697 = vrsqrt.f32 %v338_v32 }
 0x1ac   :  { %v686_v23 = vpop.eup %685  ;;  %v558_v7 = vpack.c.bf16 %v381_v4, %v380_v3  ;;  %v363_v8 = vmul.f32 %v684_v31, %v835_v45 }
 0x1ad   :  { %v538_v9 = vpack.c.bf16 %v373_v6, %v372_v5  ;;  %v362_v10 = vmul.f32 %v686_v23, %v833_v44 }
 0x1ae   :  { %578 = vst [vmem:[#allocation7 + $0x20] sm:$0xff] %v558_v7   ;;  %v379_v39 = vmul.f32 3.7796447, %v363_v8 }
 0x1af   :  { %v688_v11 = vpop.eup %687  ;;  %539 = vst [vmem:[#allocation7] sm:$0xff] %v538_v9   ;;  %v378_v38 = vmul.f32 3.7796447, %v362_v10 }
 0x1b0   :  { %v690_v12 = vpop.eup %689  ;;  %v361_v13 = vmul.f32 %v688_v11, %v843_v51 }
 0x1b1   :  { %v553_v14 = vpack.c.bf16 %v379_v39, %v378_v38  ;;  %v360_v15 = vmul.f32 %v690_v12, %v841_v50 }
 0x1b2   :  { %v377_v16 = vmul.f32 3.7796447, %v361_v13 }
 0x1b3   :  { %v692_v17 = vpop.eup %691  ;;  %577 = vst [vmem:[#allocation7 + $0x18] sm:$0xff] %v553_v14   ;;  %v376_v18 = vmul.f32 3.7796447, %v360_v15 }
 0x1b4   :  { %v694_v21 = vpop.eup %693  ;;  %v369_v45 = vmul.f32 %v692_v17, %v851_v56 }
 0x1b5   :  { %v548_v22 = vpack.c.bf16 %v377_v16, %v376_v18  ;;  %v368_v44 = vmul.f32 %v694_v21, %v849_v55 }
 0x1b6   :  { %v385_v24 = vmul.f32 3.7796447, %v369_v45 }
 0x1b7   :  { %v696_v25 = vpop.eup %695  ;;  %576 = vst [vmem:[#allocation7 + $0x10] sm:$0xff] %v548_v22   ;;  %v384_v26 = vmul.f32 3.7796447, %v368_v44 }
 0x1b8   :  { %v698_v27 = vpop.eup %697  ;;  %v371_v51 = vmul.f32 %v696_v25, %v859_v60 }
 0x1b9   :  { %v568_v29 = vpack.c.bf16 %v385_v24, %v384_v26  ;;  %v370_v50 = vmul.f32 %v698_v27, %v857_v59 }
 0x1ba   :  { %v387_v30 = vmul.f32 3.7796447, %v371_v51 }
 0x1bb   :  { %580 = vst [vmem:[#allocation7 + $0x30] sm:$0xff] %v568_v29   ;;  %v386_v33 = vmul.f32 3.7796447, %v370_v50 }
 0x1bd   :  { %v573_v34 = vpack.c.bf16 %v387_v30, %v386_v33 }
 0x1bf   :  { %581 = vst [vmem:[#allocation7 + $0x38] sm:$0xff] %v573_v34  }
 0x1c0   :  { %750 = shalt.err (!%p747_p0)
}
 0x1c1   :  { %479 = dma.vmem_to_hbm [thread:$0]  %s474_s24, 1024, %s894_s3, [#allocation4], %s766_s15, %s766_s15, %s767_s16  }
 0x1c2   :  { %763 = dma.done.wait [#allocation4], 1024  }
 0x1c3   :  { %764 = vsyncadd [#allocation4], 4294966272 }
 0x1c4   :  { %483 = vsyncpa [#allocation3], 1 }
 0x1c5   :  { %484 = vsyncpa [#allocation6], 1 }
 0x1c6   :  { %485 = vsyncpa [#allocation4], 1 }

</bundles_post_ra>
